<compile_context>
chip_gen: v6e
topology: v6e:2x2x1
jax: 0.10.0
libtpu: 0.0.40
codegen_flags: <defaults>
</compile_context>

<pallas_src>
import functools

import jax
import jax.numpy as jnp
from jax.experimental import pallas as pl
from jax.experimental.pallas import tpu as pltpu


def _flicker_kernel(mask_ref, x_ref, out_ref, *, C, tile_r, n_rows,
                    need_row_mask):
    # mask_ref: (1, L) f32 lane-validity mask. Lane j is 1.0 iff the value C
    #           lanes earlier is its genuine temporal predecessor, i.e.
    #           (j % (T*C)) >= C; 0.0 at frame-0 lanes / fold boundaries /
    #           roll wraparound lanes.
    # x_ref:    (tile_r, L) block of the flattened prediction tensor.
    # out_ref:  (1, 1) SMEM partial-sum slot for this grid step.
    x = x_ref[...]
    # Temporal neighbour via lane rotation (XLU): rolled[j] = x[j - C mod L].
    xr = pltpu.roll(x, shift=C, axis=1)
    # |bin(t) - bin(t-1)| on thresholded 0/1 values == (bin(t) != bin(t-1)).
    neq = (x > 0) != (xr > 0)
    # Zero out pairs that are not real temporal neighbours.
    d = jnp.where(neq, mask_ref[...], 0.0)               # (tile_r, L) f32 0/1

    row_sums = jnp.sum(d, axis=1, keepdims=True)          # (tile_r, 1)
    if need_row_mask:
        # Tail block hangs past the array: mask out-of-range rows (cheap:
        # only tile_r values, not tile_r * L).
        rows = (jax.lax.broadcasted_iota(jnp.int32, (tile_r, 1), 0)
                + pl.program_id(0) * tile_r)
        row_sums = jnp.where(rows < n_rows, row_sums, 0.0)

    out_ref[0, 0] = jnp.sum(row_sums)


def mean_temporal_flicker_score(pred, target=None, *,
                                target_block_bytes=4 * 1024 * 1024):
    """pred: (B, H, W, T, C) array. Returns scalar mean temporal flicker (f32)."""
    B, H, W, T, C = pred.shape
    assert T >= 2, "need at least 2 frames"
    K = T * C

    # Fold trailing spatial dims into the lane axis until rows are lane-dense.
    # Reshape is a contiguous collapse -> no data movement, one HBM read total.
    s_fold = 1
    spatial = [B, H, W]
    while spatial and s_fold * K < 512:
        s_fold *= spatial.pop()
    R = (B * H * W) // s_fold
    L = s_fold * K
    x = pred.reshape(R, L)

    # Full-width lane-validity mask: lane j's rolled partner (j - C) is a real
    # temporal predecessor iff (j % K) >= C (frame index >= 1 inside its own
    # fold element). This also zeroes the roll wraparound lanes (j < C).
    lane_idx = jnp.arange(L, dtype=jnp.int32)
    lane_mask = ((lane_idx % K) >= C).astype(jnp.float32).reshape(1, L)

    # Block sizing: ~target_block_bytes per (lane-padded) input block, rows a
    # multiple of 8 sublanes. 4 MiB default is safe on v7x's 64 MiB VMEM and
    # keeps the per-grid-step (~0.35 us) overhead negligible on v5e/v6e.
    itemsize = jnp.dtype(pred.dtype).itemsize
    Lpad = ((L + 127) // 128) * 128
    tile_r = max(8, (target_block_bytes // (itemsize * Lpad)) // 8 * 8)
    if tile_r >= R:
        tile_r = R                      # single block covering all rows
    num_blocks = pl.cdiv(R, tile_r)
    need_row_mask = (R % tile_r) != 0

    kernel = functools.partial(_flicker_kernel, C=C, tile_r=tile_r,
                               n_rows=R, need_row_mask=need_row_mask)

    cost = pl.CostEstimate(
        flops=5 * R * L,                                   # cmp/cmp/neq/sel/add
        transcendentals=0,
        bytes_accessed=R * L * itemsize + L * 4 + num_blocks * 4)

    partials = pl.pallas_call(
        kernel,
        out_shape=jax.ShapeDtypeStruct((num_blocks, 1), jnp.float32),
        grid_spec=pltpu.PrefetchScalarGridSpec(
            num_scalar_prefetch=0,
            grid=(num_blocks,),
            in_specs=[
                pl.BlockSpec((1, L), lambda i: (0, 0)),      # lane mask (resident)
                pl.BlockSpec((tile_r, L), lambda i: (i, 0)),  # data block
            ],
            out_specs=pl.BlockSpec((1, 1), lambda i: (i, 0),
                                   memory_space=pltpu.SMEM),
        ),
        compiler_params=pltpu.CompilerParams(
            dimension_semantics=("parallel",),
            vmem_limit_bytes=48 * 1024 * 1024),
        cost_estimate=cost,
    )(lane_mask, x)

    count = B * H * W * C * (T - 1)
    return jnp.sum(partials) / jnp.float32(count)


def _reference(pred):
    """Pure-JAX reference mirroring the PyTorch module."""
    p = (pred > 0.0).astype(jnp.float32)            # (B, H, W, T, C)
    p = jnp.transpose(p, (0, 4, 1, 2, 3))           # (B, C, H, W, T)
    flicker = jnp.abs(p[..., 1:] - p[..., :-1])
    return flicker.mean()


if __name__ == "__main__":
    key = jax.random.PRNGKey(0)
    B, H, W, T, C = 2, 16, 16, 8, 4
    pred = jax.random.normal(key, (B, H, W, T, C), dtype=jnp.float32)
    target = jnp.zeros_like(pred)  # ignored by the module; kept for signature parity

    out = mean_temporal_flicker_score(pred, target)
    out = jax.block_until_ready(out)

    ref = _reference(pred)
    assert jnp.allclose(out, ref, atol=1e-6, rtol=1e-6), (out, ref)
    print("KERNEL_OK")
</pallas_src>

<mosaic_0001>
module attributes {stable_mosaic.version = 11 : i64} {
  func.func @_flicker_kernel(%arg0: i32, %arg1: memref<1x512xf32, #tpu.memory_space<vmem>>, %arg2: memref<32x512xf32, #tpu.memory_space<vmem>>, %arg3: memref<1x1xf32, #tpu.memory_space<smem>>) attributes {dimension_semantics = [#tpu.dimension_semantics<parallel>], iteration_bounds = array<i64: 1>, scalar_prefetch = 0 : i64, scratch_operands = 0 : i64, tpu.core_type = #tpu.core_type<tc>, window_params = [{pipeline_mode = #tpu.pipeline_mode<synchronous>, transform_indices = @transform_0, window_bounds = array<i64: 1, 512>}, {transform_indices = @transform_1, window_bounds = array<i64: 32, 512>}, {transform_indices = @transform_2, window_bounds = array<i64: 1, 1>}]} {
    %c0 = arith.constant 0 : index
    %c0_0 = arith.constant 0 : index
    %0 = vector.load %arg2[%c0, %c0_0] : memref<32x512xf32, #tpu.memory_space<vmem>>, vector<32x512xf32>
    %c4_i32 = arith.constant 4 : i32
    %1 = tpu.dynamic_rotate %0 by %c4_i32 dim 1 : vector<32x512xf32>, i32 -> vector<32x512xf32>
    %cst = arith.constant 0.000000e+00 : f32
    %2 = vector.broadcast %cst : f32 to vector<32x512xf32>
    %3 = arith.cmpf ogt, %0, %2 : vector<32x512xf32>
    %cst_1 = arith.constant 0.000000e+00 : f32
    %4 = vector.broadcast %cst_1 : f32 to vector<32x512xf32>
    %5 = arith.cmpf ogt, %1, %4 : vector<32x512xf32>
    %6 = arith.xori %3, %5 : vector<32x512xi1>
    %c0_2 = arith.constant 0 : index
    %c0_3 = arith.constant 0 : index
    %7 = vector.load %arg1[%c0_2, %c0_3] : memref<1x512xf32, #tpu.memory_space<vmem>>, vector<1x512xf32>
    %cst_4 = arith.constant 0.000000e+00 : f32
    %8 = vector.shape_cast %7 : vector<1x512xf32> to vector<1x512xf32>
    %9 = vector.broadcast %8 : vector<1x512xf32> to vector<32x512xf32>
    %10 = vector.broadcast %cst_4 : f32 to vector<32x512xf32>
    %11 = arith.select %6, %9, %10 : vector<32x512xi1>, vector<32x512xf32>
    %cst_5 = arith.constant dense<0.000000e+00> : vector<32xf32>
    %12 = vector.multi_reduction <add>, %11, %cst_5 [1] : vector<32x512xf32> to vector<32xf32>
    %13 = vector.shape_cast %12 : vector<32xf32> to vector<32x1xf32>
    %14 = vector.shape_cast %13 : vector<32x1xf32> to vector<1x32x1xf32>
    %cst_6 = arith.constant dense<0.000000e+00> : vector<1xf32>
    %15 = vector.multi_reduction <add>, %14, %cst_6 [1, 2] : vector<1x32x1xf32> to vector<1xf32>
    %16 = vector.shape_cast %15 : vector<1xf32> to vector<1x1x1xf32>
    %17 = vector.extract %16[0, 0, 0] : f32 from vector<1x1x1xf32>
    %c0_7 = arith.constant 0 : index
    %c0_8 = arith.constant 0 : index
    %18 = memref.load %arg3[%c0_7, %c0_8] : memref<1x1xf32, #tpu.memory_space<smem>>
    memref.store %17, %arg3[%c0_7, %c0_8] : memref<1x1xf32, #tpu.memory_space<smem>>
    return
  }
  func.func @transform_0(%arg0: i32) -> (i32, i32) {
    %c0_i32 = arith.constant 0 : i32
    %c0_i32_0 = arith.constant 0 : i32
    %c0_i32_1 = arith.constant 0 : i32
    return %c0_i32, %c0_i32_0 : i32, i32
  }
  func.func @transform_1(%arg0: i32) -> (i32, i32) {
    %c0_i32 = arith.constant 0 : i32
    %c0_i32_0 = arith.constant 0 : i32
    return %arg0, %c0_i32 : i32, i32
  }
  func.func @transform_2(%arg0: i32) -> (i32, i32) {
    %c0_i32 = arith.constant 0 : i32
    %c0_i32_0 = arith.constant 0 : i32
    return %arg0, %c0_i32 : i32, i32
  }
}

</mosaic_0001>

<bundles_post_ra>
// kernel: tpu_custom_call.1
= control target key start
LH: loop header
LB: loop body
LE: loop exit
PB: predicated region body
PF: predicated region fallthrough
CT: control target
= control target key end

     0   :  { %7 = vsyncpa [#allocation3], 0  ;;  %s474_s0 = inlined_call_operand.hbm [shape: f32[1,512], index: 0, kind: input, shape index: {}]   ;;  %s475_s1 = inlined_call_operand.hbm [shape: f32[32,512], index: 1, kind: input, shape index: {}]   ;;  %s476_s2 = inlined_call_operand.hbm [shape: f32[1,1], index: 2, kind: output, shape index: {}]  }
   0x1   :  { %8 = vsyncpa [#allocation6], 0 }
   0x2   :  { %9 = vsyncpa [#allocation4], 0  ;;  %s307_s9 = smov [#allocation2]   ;;  %s308_s11 = smov [#allocation5]  }
   0x3   :  { %s16_s10 = sshll.u32 %s307_s9, 4  ;;  %s25_s12 = sshll.u32 %s308_s11, 4  ;;  %s17_s10 = int_to_ptr.vmem [resolvable:$true] %s16_s10  ;;  %s26_s12 = int_to_ptr.vmem [resolvable:$true] %s25_s12 }
   0x4   :  { %s261_s13 = scalar_lea.vmem %s17_s10, 64  ;;  %p266_p1 = scmp.lt.s32.totalorder %s17_s10, %s17_s10 }
   0x5   :  { %p262_p0 = scmp.ne.s32.totalorder %s17_s10, %s261_s13  ;;  %p267_p2 = scmp.lt.s32.totalorder %s261_s13, %s261_s13 }
   0x7   :  { %p268_p3 = por %p267_p2, %p266_p1 }
   0x9   :  { %p269_p4 = pnand %p268_p3, %p262_p0 }
   0xb   :  { %272 = shalt.err (!%p269_p4)
}
   0xc   :  { %19 = dma.hbm_to_vmem [thread:$0]  %s474_s0, 64, %s17_s10, [#allocation3]  }
   0xd   :  { %s281_s16 = scalar_lea.vmem %s26_s12, 2048  ;;  %p286_p6 = scmp.lt.s32.totalorder %s26_s12, %s26_s12 }
   0xe   :  { %p282_p5 = scmp.ne.s32.totalorder %s26_s12, %s281_s16  ;;  %p287_p7 = scmp.lt.s32.totalorder %s281_s16, %s281_s16 }
  0x10   :  { %p288_p8 = por %p287_p7, %p286_p6 }
  0x12   :  { %p289_p9 = pnand %p288_p8, %p282_p5 }
  0x14   :  { %292 = shalt.err (!%p289_p9)
}
  0x15   :  { %s309_s17 = smov 512   ;;  %s310_s18 = smov 32  }
  0x16   :  { %31 = dma.hbm_to_vmem [thread:$0]  %s475_s1, 2048, %s26_s12, [#allocation6], %s309_s17, %s309_s17, %s310_s18  }
  0x17   :  { %301 = dma.done.wait [#allocation3], 64  }
  0x18   :  { %302 = vsyncadd [#allocation3], 4294967232 }
  0x19   :  { %303 = dma.done.wait [#allocation6], 2048  }
  0x1a   :  { %304 = vsyncadd [#allocation6], 4294965248  ;;  %v39_v0 = vld [vmem:[#allocation5 + $0x8] sm:$0xff]  ;;  %v334_v1 = vld [vmem:[#allocation5] sm:$0xff]  ;;  %s311_s0 = smov 4   ;;  %v86_v16 = vlaneseq  ;;  %s312_s21 = smov [#allocation7]  }
  0x1b   :  { %62 = vrot.lane.b32.xlu1 %v39_v0, %s311_s0  ;;  %54 = vrot.lane.b32.xlu0 %v334_v1, %s311_s0  ;;  %v43_v2 = vld [vmem:[#allocation5 + $0x28] sm:$0xff]  ;;  %v42_v3 = vld [vmem:[#allocation5 + $0x20] sm:$0xff]  ;;  %v337_v4 = vld [vmem:[#allocation5 + $0x38] sm:$0xff]  ;;  %vm106_vm3 = vcmp.gt.f32.partialorder %v39_v0, 0.0  ;;  %vm105_vm6 = vcmp.gt.f32.partialorder %v334_v1, 0.0 }
  0x1c   :  { %v339_v5 = vld [vmem:[#allocation5 + $0x18] sm:$0xff]  ;;  %v343_v6 = vld [vmem:[#allocation5 + $0x48] sm:$0xff]  ;;  %v345_v7 = vld [vmem:[#allocation5 + $0x40] sm:$0xff]  ;;  %v373_v17 = vand.u32 127, %v86_v16  ;;  %v156_v20 = vshrl.u32 %v86_v16, 7  ;;  %vm110_vm1 = vcmp.gt.f32.partialorder %v43_v2, 0.0 }
  0x1d   :  { %v349_v8 = vld [vmem:[#allocation5 + $0x30] sm:$0xff]  ;;  %v355_v10 = vld [vmem:[#allocation5 + $0x60] sm:$0xff]  ;;  %v357_v11 = vld [vmem:[#allocation5 + $0x58] sm:$0xff]  ;;  %vm109_vm5 = vcmp.gt.f32.partialorder %v42_v3, 0.0  ;;  %vm114_vm13 = vcmp.gt.f32.partialorder %v343_v6, 0.0  ;;  %vm112_vm15 = vcmp.gt.f32.partialorder %v337_v4, 0.0 }
  0x1e   :  { %v351_v9 = vld [vmem:[#allocation5 + $0x10] sm:$0xff]  ;;  %v363_v13 = vld [vmem:[#allocation5 + $0x68] sm:$0xff]  ;;  %v369_v15 = vld [vmem:[#allocation5 + $0x78] sm:$0xff]  ;;  %vm88_vm0 = vcmp.lt.s32.totalorder %v373_v17, 4  ;;  %v157_v24 = vsub.s32 0, %v156_v20  ;;  %v161_v25 = vsub.s32 1, %v156_v20 }
  0x1f   :  { %64 = vrot.lane.b32.xlu1 %v43_v2, %s311_s0  ;;  %56 = vrot.lane.b32.xlu0 %v42_v3, %s311_s0  ;;  %v361_v12 = vld [vmem:[#allocation5 + $0x50] sm:$0xff]  ;;  %v153_v27 = vld [vmem:[#allocation2] sm:$0xf]  ;;  %v165_v38 = vsub.s32 2, %v156_v20  ;;  %v169_v44 = vsub.s32 3, %v156_v20 }
  0x20   :  { %v367_v14 = vld [vmem:[#allocation5 + $0x70] sm:$0xff]  ;;  %v380_v28 = vrot.slane %v153_v27, %v157_v24  ;;  %v383_v31 = vrot.slane %v153_v27, %v161_v25 }
  0x21   :  { %v399_v45 = vrot.slane %v153_v27, %v165_v38  ;;  %v413_v53 = vrot.slane %v153_v27, %v169_v44 }
  0x23   :  { %80 = vrot.lane.b32.xlu1 %v337_v4, %s311_s0  ;;  %78 = vrot.lane.b32.xlu0 %v339_v5, %s311_s0 }
  0x27   :  { %66 = vrot.lane.b32.xlu1 %v343_v6, %s311_s0  ;;  %58 = vrot.lane.b32.xlu0 %v345_v7, %s311_s0 }
  0x2b   :  { %72 = vrot.lane.b32.xlu1 %v349_v8, %s311_s0  ;;  %70 = vrot.lane.b32.xlu0 %v351_v9, %s311_s0 }
  0x2f   :  { %60 = vrot.lane.b32.xlu1 %v355_v10, %s311_s0  ;;  %82 = vrot.lane.b32.xlu0 %v357_v11, %s311_s0 }
  0x33   :  { %74 = vrot.lane.b32.xlu1 %v361_v12, %s311_s0  ;;  %68 = vrot.lane.b32.xlu0 %v363_v13, %s311_s0 }
  0x37   :  { %76 = vrot.lane.b32.xlu1 %v367_v14, %s311_s0  ;;  %84 = vrot.lane.b32.xlu0 %v369_v15, %s311_s0 }
  0x8d   :  { %v63_v18 = vpop.permute.xlu1 %62  ;;  %v55_v19 = vpop.permute.xlu0 %54 }
  0x8e   :  { %v97_v21 = vsel %vm88_vm0, %v55_v19, %v63_v18 }
  0x8f   :  { %vm122_vm4 = vcmp.gt.f32.partialorder %v97_v21, 0.0 }
  0x90   :  { %vm138_vm8 = vmxor %vm106_vm3, %vm122_vm4 }
  0x91   :  { %v65_v22 = vpop.permute.xlu1 %64  ;;  %v57_v23 = vpop.permute.xlu0 %56  ;;  %v176_v39 = vsel %vm138_vm8, %v383_v31, 0.0 }
  0x92   :  { %v98_v26 = vsel %vm88_vm0, %v57_v23, %v65_v22 }
  0x93   :  { %vm126_vm2 = vcmp.gt.f32.partialorder %v98_v26, 0.0 }
  0x94   :  { %vm142_vm7 = vmxor %vm110_vm1, %vm126_vm2  ;;  %vm111_vm1 = vcmp.gt.f32.partialorder %v349_v8, 0.0  ;;  %vm107_vm2 = vcmp.gt.f32.partialorder %v351_v9, 0.0 }
  0x95   :  { %v81_v29 = vpop.permute.xlu1 %80  ;;  %v79_v30 = vpop.permute.xlu0 %78  ;;  %v180_v34 = vsel %vm142_vm7, %v383_v31, 0.0  ;;  %vm108_vm7 = vcmp.gt.f32.partialorder %v339_v5, 0.0 }
  0x96   :  { %v102_v32 = vsel %vm88_vm0, %v81_v29, %v57_v23  ;;  %v101_v33 = vsel %vm88_vm0, %v79_v30, %v55_v19 }
  0x97   :  { %vm125_vm9 = vcmp.gt.f32.partialorder %v102_v32, 0.0  ;;  %vm121_vm10 = vcmp.gt.f32.partialorder %v101_v33, 0.0 }
  0x98   :  { %vm141_vm11 = vmxor %vm109_vm5, %vm125_vm9 }
  0x99   :  { %v179_v35 = vsel %vm141_vm11, %v380_v28, 0.0  ;;  %vm137_vm12 = vmxor %vm105_vm6, %vm121_vm10  ;;  %v67_v36 = vpop.permute.xlu1 %66  ;;  %v59_v37 = vpop.permute.xlu0 %58  ;;  %vm113_vm10 = vcmp.gt.f32.partialorder %v345_v7, 0.0 }
  0x9a   :  { %v196_v40 = vadd.f32 %v180_v34, %v179_v35  ;;  %v175_v41 = vsel %vm137_vm12, %v380_v28, 0.0  ;;  %v99_v42 = vsel %vm88_vm0, %v59_v37, %v67_v36 }
  0x9b   :  { %v191_v43 = vadd.f32 %v176_v39, %v175_v41  ;;  %vm130_vm14 = vcmp.gt.f32.partialorder %v99_v42, 0.0 }
  0x9c   :  { %vm409_vm3 = vmxor %vm114_vm13, %vm130_vm14 }
  0x9d   :  { %v73_v46 = vpop.permute.xlu1 %72  ;;  %v71_v47 = vpop.permute.xlu0 %70  ;;  %v184_v0 = vsel %vm409_vm3, %v383_v31, 0.0 }
  0x9e   :  { %v90_v48 = vsel %vm88_vm0, %v73_v46, %v81_v29  ;;  %v94_v49 = vsel %vm88_vm0, %v65_v22, %v73_v46  ;;  %v89_v50 = vsel %vm88_vm0, %v71_v47, %v79_v30  ;;  %v93_v51 = vsel %vm88_vm0, %v63_v18, %v71_v47 }
  0x9f   :  { %vm127_vm4 = vcmp.gt.f32.partialorder %v94_v49, 0.0  ;;  %vm128_vm5 = vcmp.gt.f32.partialorder %v90_v48, 0.0  ;;  %vm123_vm6 = vcmp.gt.f32.partialorder %v93_v51, 0.0  ;;  %vm124_vm9 = vcmp.gt.f32.partialorder %v89_v50, 0.0 }
  0xa0   :  { %vm143_vm8 = vmxor %vm111_vm1, %vm127_vm4  ;;  %vm115_vm1 = vcmp.gt.f32.partialorder %v361_v12, 0.0 }
  0xa1   :  { %vm144_vm11 = vmxor %vm112_vm15, %vm128_vm5  ;;  %v181_v54 = vsel %vm143_vm8, %v399_v45, 0.0  ;;  %v61_v55 = vpop.permute.xlu1 %60  ;;  %v83_v56 = vpop.permute.xlu0 %82  ;;  %vm118_vm5 = vcmp.gt.f32.partialorder %v363_v13, 0.0  ;;  %vm119_vm8 = vcmp.gt.f32.partialorder %v367_v14, 0.0 }
  0xa2   :  { %vm139_vm12 = vmxor %vm107_vm2, %vm123_vm6  ;;  %v103_v57 = vsel %vm88_vm0, %v83_v56, %v59_v37  ;;  %v197_v58 = vadd.f32 %v196_v40, %v181_v54  ;;  %v182_v61 = vsel %vm144_vm11, %v413_v53, 0.0  ;;  %vm116_vm2 = vcmp.gt.f32.partialorder %v357_v11, 0.0 }
  0xa3   :  { %vm426_vm13 = vmxor %vm108_vm7, %vm124_vm9  ;;  %v177_v60 = vsel %vm139_vm12, %v399_v45, 0.0  ;;  %vm129_vm14 = vcmp.gt.f32.partialorder %v103_v57, 0.0  ;;  %vm117_vm9 = vcmp.gt.f32.partialorder %v355_v10, 0.0 }
  0xa4   :  { %vm145_vm15 = vmxor %vm113_vm10, %vm129_vm14  ;;  %v198_v62 = vadd.f32 %v197_v58, %v182_v61  ;;  %v192_v63 = vadd.f32 %v191_v43, %v177_v60  ;;  %v178_v4 = vsel %vm426_vm13, %v413_v53, 0.0  ;;  %vm120_vm14 = vcmp.gt.f32.partialorder %v369_v15, 0.0 }
  0xa5   :  { %v183_v1 = vsel %vm145_vm15, %v380_v28, 0.0  ;;  %v75_v2 = vpop.permute.xlu1 %74  ;;  %v69_v3 = vpop.permute.xlu0 %68 }
  0xa6   :  { %v201_v5 = vadd.f32 %v184_v0, %v183_v1  ;;  %v91_v6 = vsel %vm88_vm0, %v75_v2, %v83_v56  ;;  %v95_v7 = vsel %vm88_vm0, %v67_v36, %v75_v2  ;;  %v100_v8 = vsel %vm88_vm0, %v61_v55, %v69_v3  ;;  %199 = vadd.xlane.f32.xlu1 %v198_v62 }
  0xa7   :  { %vm131_vm3 = vcmp.gt.f32.partialorder %v95_v7, 0.0  ;;  %vm132_vm4 = vcmp.gt.f32.partialorder %v91_v6, 0.0  ;;  %v193_v9 = vadd.f32 %v192_v63, %v178_v4  ;;  %vm134_vm7 = vcmp.gt.f32.partialorder %v100_v8, 0.0 }
  0xa8   :  { %vm450_vm6 = vmxor %vm115_vm1, %vm131_vm3 }
  0xa9   :  { %v185_v18 = vsel %vm450_vm6, %v399_v45, 0.0  ;;  %194 = vadd.xlane.f32.xlu0 %v193_v9  ;;  %v77_v11 = vpop.permute.xlu1 %76  ;;  %v85_v19 = vpop.permute.xlu0 %84  ;;  %vm148_vm10 = vmxor %vm116_vm2, %vm132_vm4 }
  0xaa   :  { %v96_v12 = vsel %vm88_vm0, %v69_v3, %v77_v11  ;;  %v92_v13 = vsel %vm88_vm0, %v77_v11, %v85_v19  ;;  %v104_v20 = vsel %vm88_vm0, %v85_v19, %v61_v55  ;;  %vm150_vm11 = vmxor %vm118_vm5, %vm134_vm7  ;;  %v202_v14 = vadd.f32 %v201_v5, %v185_v18 }
  0xab   :  { %vm135_vm12 = vcmp.gt.f32.partialorder %v96_v12, 0.0  ;;  %vm133_vm13 = vcmp.gt.f32.partialorder %v104_v20, 0.0  ;;  %vm136_vm1 = vcmp.gt.f32.partialorder %v92_v13, 0.0  ;;  %v186_v10 = vsel %vm148_vm10, %v413_v53, 0.0 }
  0xac   :  { %vm151_vm15 = vmxor %vm119_vm8, %vm135_vm12  ;;  %v188_v21 = vsel %vm150_vm11, %v383_v31, 0.0  ;;  %v203_v23 = vadd.f32 %v202_v14, %v186_v10  ;;  %vm211_vm0 = vcmask 7168  }
  0xad   :  { %vm149_vm3 = vmxor %vm117_vm9, %vm133_vm13  ;;  %v189_v17 = vsel %vm151_vm15, %v399_v45, 0.0 }
  0xae   :  { %v187_v22 = vsel %vm149_vm3, %v380_v28, 0.0  ;;  %vm152_vm2 = vmxor %vm120_vm14, %vm136_vm1  ;;  %204 = vadd.xlane.f32.xlu0 %v203_v23 }
  0xaf   :  { %v206_v24 = vadd.f32 %v188_v21, %v187_v22  ;;  %v190_v26 = vsel %vm152_vm2, %v413_v53, 0.0 }
  0xb1   :  { %v207_v25 = vadd.f32 %v206_v24, %v189_v17 }
  0xb3   :  { %v208_v15 = vadd.f32 %v207_v25, %v190_v26 }
  0xb5   :  { %209 = vadd.xlane.f32.xlu0 %v208_v15 }
 0x12f   :  { %v200_v29 = vpop.xlane.xlu1 %199 }
 0x130   :  { %v213_v30 = vsel %vm211_vm0, %v200_v29, 0.0 }
 0x132   :  { %v195_v27 = vpop.xlane.xlu0 %194 }
 0x133   :  { %v212_v32 = vsel %vm211_vm0, %v195_v27, 0.0 }
 0x134   :  { %v214_v34 = vadd.f32 %v213_v30, %v212_v32 }
 0x137   :  { %v205_v33 = vpop.xlane.xlu0 %204 }
 0x138   :  { %v215_v31 = vsel %vm211_vm0, %v205_v33, 0.0 }
 0x139   :  { %v216_v28 = vadd.f32 %v215_v31, %v214_v34 }
 0x13e   :  { %v210_v35 = vpop.xlane.xlu0 %209 }
 0x13f   :  { %v217_v36 = vsel %vm211_vm0, %v210_v35, 0.0 }
 0x140   :  { %v218_v37 = vadd.f32 %v217_v36, %v216_v28 }
 0x142   :  { %219 = vadd.xlane.f32.xlu1 %v218_v37 }
 0x1cb   :  { %v220_v38 = vpop.xlane.xlu1 %219 }
 0x1cc   :  { %v221_v39 = vrot.slane %v220_v38, 4 }
 0x1ce   :  { %v222_v40 = vadd.f32 %v221_v39, %v220_v38 }
 0x1d0   :  { %v223_v41 = vrot.slane %v222_v40, 2 }
 0x1d2   :  { %v224_v42 = vadd.f32 %v223_v41, %v222_v40 }
 0x1d4   :  { %v225_v43 = vrot.slane %v224_v42, 1 }
 0x1d6   :  { %v226_v44 = vadd.f32 %v225_v43, %v224_v42 }
 0x1d8   :  { %245 = vpush %v226_v44 }
 0x209   :  { %s246_s1 = spop %245 }
 0x20a   :  { %229 = sst [smem:[#allocation7]] %s246_s1 }
 0x20b   :  { %237 = dma.smem_to_hbm %s312_s21, 16, %s476_s2, [#allocation4]  }
 0x20c   :  { %305 = dma.done.wait [#allocation4], 16  }
 0x20d   :  { %306 = vsyncadd [#allocation4], 4294967280 }
 0x20e   :  { %241 = sfence }
 0x20f   :  { %242 = vsyncpa [#allocation3], 1 }
 0x210   :  { %243 = vsyncpa [#allocation6], 1 }
 0x211   :  { %244 = vsyncpa [#allocation4], 1 }

</bundles_post_ra>
